<compile_context>
chip_gen: v7x
topology: tpu7x:2x2x1
jax: 0.10.0
libtpu: 0.0.40
codegen_flags: <defaults>
</compile_context>

<pallas_src>
import functools
import math

import jax
import jax.numpy as jnp
from jax.experimental import pallas as pl
from jax.experimental.pallas import tpu as pltpu


# ----------------------------------------------------------------------------
# In-kernel helpers
# ----------------------------------------------------------------------------
def _layer_norm(x, w, b, eps=1e-5):
    # x: [R, D] (f32), w/b: [1, D]
    mu = jnp.mean(x, axis=-1, keepdims=True)
    var = jnp.mean((x - mu) ** 2, axis=-1, keepdims=True)
    return (x - mu) * jax.lax.rsqrt(var + eps) * w + b


def _pick_row_tile(L, cap=256):
    # largest row tile <= cap that divides L (multiple of 8), else whole L
    for t in (256, 128, 64, 32, 16, 8):
        if t <= cap and L % t == 0:
            return t
    return L


def _pick_batch_tile(N, S_pad, max_rows=512):
    # biggest B with B*S_pad <= max_rows rows (v7x 64 MiB VMEM budget), but
    # keep >= 2 steps on the parallel batch axis when possible (v7x 2 TCs).
    best = 1
    for b in range(1, N + 1):
        if N % b == 0 and b * S_pad <= max_rows:
            best = b
    if N // best < 2:
        for b in range(best, 0, -1):
            if N % b == 0 and N // b >= 2:
                return b
    return best


# ----------------------------------------------------------------------------
# Kernel 1: patch embedding (conv w/ kernel=stride=patch == matmul) + pos add
#   grid=(N, L//tl); pos is indexed by the L-tile only (broadcast over N via
#   index_map reuse — no materialized [N*L, D] HBM array).
# ----------------------------------------------------------------------------
def patch_embed_kernel(xp_ref, w_ref, b_ref, pos_ref, o_ref):
    x = xp_ref[0].astype(jnp.bfloat16)                       # [tl, P]
    y = jnp.dot(x, w_ref[...], preferred_element_type=jnp.float32)
    o_ref[0] = (y + b_ref[...] + pos_ref[...]).astype(o_ref.dtype)


def patch_embed(xp, w_bf16, b, pos):
    # xp: [N, L, P] f32; w: [P, D] bf16; b: [1, D] f32; pos: [L, D] f32
    N, L, P = xp.shape
    D = w_bf16.shape[1]
    tl = _pick_row_tile(L, cap=256)
    return pl.pallas_call(
        patch_embed_kernel,
        out_shape=jax.ShapeDtypeStruct((N, L, D), jnp.float32),
        grid=(N, L // tl),
        in_specs=[
            pl.BlockSpec((1, tl, P), lambda n, l: (n, l, 0)),
            pl.BlockSpec((P, D), lambda n, l: (0, 0)),
            pl.BlockSpec((1, D), lambda n, l: (0, 0)),
            pl.BlockSpec((tl, D), lambda n, l: (l, 0)),
        ],
        out_specs=pl.BlockSpec((1, tl, D), lambda n, l: (n, l, 0)),
        compiler_params=pltpu.CompilerParams(
            dimension_semantics=("parallel", "parallel")),
    )(xp, w_bf16, b, pos)


# ----------------------------------------------------------------------------
# Kernel 2: fused transformer stack (all depth blocks + final LayerNorm)
#   grid = (N//B, depth); tokens stay resident in a (B*S, D) f32 VMEM scratch
#   across the depth axis; per-layer bf16 weights stream in via index_map.
# ----------------------------------------------------------------------------
_BLOCK_PARAM_ORDER = ("ln1w", "ln1b", "qkvw", "qkvb", "projw", "projb",
                      "ln2w", "ln2b", "fc1w", "fc1b", "fc2w", "fc2b")


def stack_kernel(x_ref, ln1w, ln1b, qkvw, qkvb, projw, projb,
                 ln2w, ln2b, fc1w, fc1b, fc2w, fc2b,
                 kbias, normw, normb, o_ref, acc_ref, *, num_heads):
    d = pl.program_id(1)
    bf16 = jnp.bfloat16
    B, S, D = x_ref.shape
    R = B * S
    nh = num_heads
    hd = D // nh
    scale = 1.0 / (hd ** 0.5)

    @pl.when(d == 0)
    def _():
        acc_ref[...] = x_ref[...].reshape(R, D).astype(jnp.float32)

    x = acc_ref[...]                                          # [R, D] f32

    # ----- attention branch (pre-LN); bf16 operands, f32 accumulation -----
    xn = _layer_norm(x, ln1w[0], ln1b[0])
    qkv = jnp.dot(xn.astype(bf16), qkvw[0],
                  preferred_element_type=jnp.float32) + qkvb[0]      # [R, 3D]
    qkv = qkv.astype(bf16)

    # Head split via static lane slices + static row slices (known-safe Mosaic
    # lowering); heads and batch fold into one leading batch dim so the two
    # attention matmuls are single batched MXU einsums.
    def heads(base):                                          # -> [B*nh, S, hd]
        cols = [qkv[:, base + h * hd: base + (h + 1) * hd] for h in range(nh)]
        return jnp.stack([c[b * S:(b + 1) * S, :]
                          for b in range(B) for c in cols], axis=0)

    q = heads(0)
    k = heads(D)
    v = heads(2 * D)

    s = jnp.einsum('hqd,hkd->hqk', q, k,
                   preferred_element_type=jnp.float32) * scale       # [B*nh,S,S]
    s = s + kbias[...][None]                                  # mask padded keys
    s = s - jnp.max(s, axis=-1, keepdims=True)
    p = jnp.exp(s)
    p = p * pl.reciprocal(jnp.sum(p, axis=-1, keepdims=True), approx=True)
    o = jnp.einsum('hqk,hkd->hqd', p.astype(bf16), v,
                   preferred_element_type=jnp.float32)                # [B*nh,S,hd]
    attn = jnp.concatenate(
        [jnp.concatenate([o[b * nh + h] for h in range(nh)], axis=-1)  # [S, D]
         for b in range(B)], axis=0)                                   # [R, D]
    x = x + jnp.dot(attn.astype(bf16), projw[0],
                    preferred_element_type=jnp.float32) + projb[0]

    # ----- MLP branch (pre-LN) -----
    xn2 = _layer_norm(x, ln2w[0], ln2b[0])
    h1 = jnp.dot(xn2.astype(bf16), fc1w[0],
                 preferred_element_type=jnp.float32) + fc1b[0]
    h1 = jax.nn.gelu(h1, approximate=False)     # exact erf GELU == torch.nn.GELU
    x = x + jnp.dot(h1.astype(bf16), fc2w[0],
                    preferred_element_type=jnp.float32) + fc2b[0]

    acc_ref[...] = x

    # fused final LayerNorm on the last block
    @pl.when(d == pl.num_programs(1) - 1)
    def _():
        o_ref[...] = _layer_norm(acc_ref[...], normw[...], normb[...]
                                 ).reshape(B, S, D).astype(o_ref.dtype)


def transformer_stack(x, blk, key_bias, norm_w, norm_b, *, num_heads):
    N, S, D = x.shape
    depth = blk["qkvw"].shape[0]
    H = blk["fc1w"].shape[2]
    B = _pick_batch_tile(N, S)

    weights = [blk[k] for k in _BLOCK_PARAM_ORDER]            # each [depth, a, b]
    w_specs = [pl.BlockSpec((1,) + tuple(w.shape[1:]), lambda n, d: (d, 0, 0))
               for w in weights]

    # scoped-VMEM budget: double-buffered per-layer weights + double-buffered
    # in/out blocks + resident f32 accumulator + qkv / h1 / score intermediates.
    w_bytes = sum(math.prod(w.shape[1:]) * w.dtype.itemsize for w in weights)
    io_bytes = B * S * D * 4
    acc_bytes = B * S * D * 4
    interm = (B * S * (3 * D + H) + B * num_heads * S * S) * 4
    need = 2 * w_bytes + 4 * io_bytes + acc_bytes + interm
    vmem_limit = max(32 << 20, min(int(1.5 * need) + (4 << 20), 64 << 20))

    return pl.pallas_call(
        functools.partial(stack_kernel, num_heads=num_heads),
        out_shape=jax.ShapeDtypeStruct((N, S, D), jnp.float32),
        grid=(N // B, depth),
        in_specs=([pl.BlockSpec((B, S, D), lambda n, d: (n, 0, 0))]
                  + w_specs
                  + [pl.BlockSpec((1, S), lambda n, d: (0, 0)),
                     pl.BlockSpec((1, D), lambda n, d: (0, 0)),
                     pl.BlockSpec((1, D), lambda n, d: (0, 0))]),
        out_specs=pl.BlockSpec((B, S, D), lambda n, d: (n, 0, 0)),
        scratch_shapes=[pltpu.VMEM((B * S, D), jnp.float32)],
        compiler_params=pltpu.CompilerParams(
            dimension_semantics=("parallel", "arbitrary"),
            vmem_limit_bytes=vmem_limit),
    )(x, *weights, key_bias, norm_w, norm_b)


# ----------------------------------------------------------------------------
# Plain-JAX glue: patch extraction, random masking
# ----------------------------------------------------------------------------
def extract_patches(x, patch_size):
    # x: [N, C, H, W] -> [N, L, C*p*p] with (c, ph, pw) ordering, matching a
    # PyTorch Conv2d(kernel=stride=p) weight flattened as [D, C*p*p].
    N, C, H, W = x.shape
    p = patch_size
    Hn, Wn = H // p, W // p
    xp = x.reshape(N, C, Hn, p, Wn, p).transpose(0, 2, 4, 1, 3, 5)
    return xp.reshape(N, Hn * Wn, C * p * p)


def random_masking(x, mask_ratio, key):
    # data-dependent shuffle/gather; kept in plain JAX (glue, not the hot path)
    N, L, D = x.shape
    len_keep = int(L * (1 - mask_ratio))
    noise = jax.random.uniform(key, (N, L))
    ids_shuffle = jnp.argsort(noise, axis=1)
    ids_restore = jnp.argsort(ids_shuffle, axis=1)
    ids_keep = ids_shuffle[:, :len_keep]
    x_masked = jnp.take_along_axis(x, ids_keep[:, :, None], axis=1)
    mask = jnp.ones((N, L), dtype=x.dtype)
    mask = mask.at[:, :len_keep].set(0.0)
    mask = jnp.take_along_axis(mask, ids_restore, axis=1)
    return x_masked, mask, ids_restore


# ----------------------------------------------------------------------------
# Parameter construction (deterministic, synthetic); matmul weights in bf16
# ----------------------------------------------------------------------------
def init_params(key, img_size, patch_size, embed_dim, mlp_ratio, depth, in_chans):
    D = embed_dim
    H = int(D * mlp_ratio)
    P = in_chans * patch_size * patch_size
    L = (img_size // patch_size) ** 2
    keys = jax.random.split(key, 3 + 4 * depth)

    def nrm(k, shape, s=0.02):
        return (s * jax.random.normal(k, shape)).astype(jnp.float32)

    params = {
        "patch_w": nrm(keys[0], (D, P)).T.astype(jnp.bfloat16),   # [P, D] bf16
        "patch_b": jnp.zeros((1, D), jnp.float32),
        "cls_token": nrm(keys[1], (1, 1, D)),
        "pos_embed": nrm(keys[2], (1, L + 1, D)),
        "norm_w": jnp.ones((1, D), jnp.float32),
        "norm_b": jnp.zeros((1, D), jnp.float32),
    }
    qkvw, projw, fc1w, fc2w = [], [], [], []
    for di in range(depth):
        bk = keys[3 + 4 * di: 3 + 4 * (di + 1)]
        qkvw.append(nrm(bk[0], (D, 3 * D)))
        projw.append(nrm(bk[1], (D, D)))
        fc1w.append(nrm(bk[2], (D, H)))
        fc2w.append(nrm(bk[3], (H, D)))
    params["blk"] = {
        "ln1w": jnp.ones((depth, 1, D), jnp.float32),
        "ln1b": jnp.zeros((depth, 1, D), jnp.float32),
        "qkvw": jnp.stack(qkvw, 0).astype(jnp.bfloat16),
        "qkvb": jnp.zeros((depth, 1, 3 * D), jnp.float32),
        "projw": jnp.stack(projw, 0).astype(jnp.bfloat16),
        "projb": jnp.zeros((depth, 1, D), jnp.float32),
        "ln2w": jnp.ones((depth, 1, D), jnp.float32),
        "ln2b": jnp.zeros((depth, 1, D), jnp.float32),
        "fc1w": jnp.stack(fc1w, 0).astype(jnp.bfloat16),
        "fc1b": jnp.zeros((depth, 1, H), jnp.float32),
        "fc2w": jnp.stack(fc2w, 0).astype(jnp.bfloat16),
        "fc2b": jnp.zeros((depth, 1, D), jnp.float32),
    }
    return params


# ----------------------------------------------------------------------------
# Full forward
# ----------------------------------------------------------------------------
def encoder_vit_forward(x, mask_ratio, params, *, patch_size, num_heads, mask_key):
    N = x.shape[0]
    xp = extract_patches(x, patch_size)                      # [N, L, P]
    _, L, P = xp.shape
    D = params["patch_w"].shape[1]

    pos = params["pos_embed"][0, 1:, :]                      # [L, D]
    tok = patch_embed(xp, params["patch_w"], params["patch_b"], pos)  # [N, L, D]

    tok, mask, ids_restore = random_masking(tok, mask_ratio, mask_key)

    cls = params["cls_token"] + params["pos_embed"][:, :1, :]
    cls = jnp.broadcast_to(cls, (N, 1, D))
    tok = jnp.concatenate([cls, tok], axis=1)                # [N, S_valid, D]
    S_valid = tok.shape[1]

    # lane-dense sequence padding (multiple of 128); padded keys are masked
    S_pad = ((S_valid + 127) // 128) * 128
    tok = jnp.pad(tok, ((0, 0), (0, S_pad - S_valid), (0, 0)))
    key_bias = jnp.where(jnp.arange(S_pad) < S_valid, 0.0, -1e30)
    key_bias = key_bias.astype(jnp.float32)[None, :]         # [1, S_pad]

    out = transformer_stack(tok, params["blk"], key_bias,
                            params["norm_w"], params["norm_b"],
                            num_heads=num_heads)
    return out[:, :S_valid, :], mask, ids_restore


# TODO(synk): drop_path is 0.0 in this config (identity); stochastic depth not implemented.


if __name__ == "__main__":
    # small config: img=16, patch=4 -> 16 patches; embed=32, heads=4,
    # mlp_ratio=2, depth=2, in_chans=1, mask_ratio=0.5 -> keep 8 tokens (+cls = 9)
    img_size, patch_size = 16, 4
    embed_dim, num_heads, mlp_ratio, depth, in_chans = 32, 4, 2.0, 2, 1
    mask_ratio = 0.5
    N = 2

    root = jax.random.PRNGKey(0)
    k_param, k_input, k_mask = jax.random.split(root, 3)

    params = init_params(k_param, img_size, patch_size, embed_dim,
                         mlp_ratio, depth, in_chans)
    x = jax.random.normal(k_input, (N, in_chans, img_size, img_size),
                          dtype=jnp.float32)

    out, mask, ids_restore = encoder_vit_forward(
        x, mask_ratio, params,
        patch_size=patch_size, num_heads=num_heads, mask_key=k_mask)

    jax.block_until_ready((out, mask, ids_restore))

    L = (img_size // patch_size) ** 2
    len_keep = int(L * (1 - mask_ratio))
    assert out.shape == (N, len_keep + 1, embed_dim)
    assert mask.shape == (N, L)
    assert ids_restore.shape == (N, L)
    assert bool(jnp.isfinite(out).all())
    print("KERNEL_OK")
</pallas_src>

<mosaic_0001>
module attributes {stable_mosaic.version = 11 : i64} {
  func.func @patch_embed_kernel(%arg0: i32, %arg1: i32, %arg2: memref<1x16x16xf32, #tpu.memory_space<vmem>>, %arg3: memref<16x32xbf16, #tpu.memory_space<vmem>>, %arg4: memref<1x32xf32, #tpu.memory_space<vmem>>, %arg5: memref<16x32xf32, #tpu.memory_space<vmem>>, %arg6: memref<1x16x32xf32, #tpu.memory_space<vmem>>) attributes {dimension_semantics = [#tpu.dimension_semantics<parallel>, #tpu.dimension_semantics<parallel>], iteration_bounds = array<i64: 2, 1>, scalar_prefetch = 0 : i64, scratch_operands = 0 : i64, tpu.core_type = #tpu.core_type<tc>, window_params = [{transform_indices = @transform_0, window_bounds = array<i64: 1, 16, 16>}, {pipeline_mode = #tpu.pipeline_mode<synchronous>, transform_indices = @transform_1, window_bounds = array<i64: 16, 32>}, {pipeline_mode = #tpu.pipeline_mode<synchronous>, transform_indices = @transform_2, window_bounds = array<i64: 1, 32>}, {transform_indices = @transform_3, window_bounds = array<i64: 16, 32>}, {transform_indices = @transform_4, window_bounds = array<i64: 1, 16, 32>}]} {
    %c0 = arith.constant 0 : index
    %c0_0 = arith.constant 0 : index
    %c0_1 = arith.constant 0 : index
    %0 = vector.load %arg2[%c0, %c0_0, %c0_1] : memref<1x16x16xf32, #tpu.memory_space<vmem>>, vector<1x16x16xf32>
    %1 = vector.shape_cast %0 : vector<1x16x16xf32> to vector<16x16xf32>
    %2 = arith.truncf %1 : vector<16x16xf32> to vector<16x16xbf16>
    %c0_2 = arith.constant 0 : index
    %c0_3 = arith.constant 0 : index
    %3 = vector.load %arg3[%c0_2, %c0_3] : memref<16x32xbf16, #tpu.memory_space<vmem>>, vector<16x32xbf16>
    %cst = arith.constant dense<0.000000e+00> : vector<16x32xf32>
    %4 = tpu.matmul %2, %3, %cst {dimension_numbers = #tpu.dot_dimension_numbers<[1], [0], [0], [1], [0, 0, 1, 1], [], []>} : vector<16x16xbf16>, vector<16x32xbf16>, vector<16x32xf32> -> vector<16x32xf32>
    %c0_4 = arith.constant 0 : index
    %c0_5 = arith.constant 0 : index
    %5 = vector.load %arg4[%c0_4, %c0_5] : memref<1x32xf32, #tpu.memory_space<vmem>>, vector<1x32xf32>
    %6 = vector.broadcast %5 : vector<1x32xf32> to vector<16x32xf32>
    %7 = arith.addf %4, %6 : vector<16x32xf32>
    %c0_6 = arith.constant 0 : index
    %c0_7 = arith.constant 0 : index
    %8 = vector.load %arg5[%c0_6, %c0_7] : memref<16x32xf32, #tpu.memory_space<vmem>>, vector<16x32xf32>
    %9 = arith.addf %7, %8 : vector<16x32xf32>
    %c0_8 = arith.constant 0 : index
    %c0_9 = arith.constant 0 : index
    %c0_10 = arith.constant 0 : index
    %10 = vector.load %arg6[%c0_8, %c0_9, %c0_10] : memref<1x16x32xf32, #tpu.memory_space<vmem>>, vector<1x16x32xf32>
    %11 = vector.shape_cast %10 : vector<1x16x32xf32> to vector<16x32xf32>
    %12 = vector.shape_cast %9 : vector<16x32xf32> to vector<1x16x32xf32>
    tpu.vector_store %arg6[%c0_8, %c0_9, %c0_10], %12 {strides = array<i32>} : memref<1x16x32xf32, #tpu.memory_space<vmem>>, vector<1x16x32xf32>,
    return
  }
  func.func @transform_0(%arg0: i32, %arg1: i32) -> (i32, i32, i32) {
    %c0_i32 = arith.constant 0 : i32
    %c0_i32_0 = arith.constant 0 : i32
    return %arg0, %arg1, %c0_i32 : i32, i32, i32
  }
  func.func @transform_1(%arg0: i32, %arg1: i32) -> (i32, i32) {
    %c0_i32 = arith.constant 0 : i32
    %c0_i32_0 = arith.constant 0 : i32
    %c0_i32_1 = arith.constant 0 : i32
    return %c0_i32, %c0_i32_0 : i32, i32
  }
  func.func @transform_2(%arg0: i32, %arg1: i32) -> (i32, i32) {
    %c0_i32 = arith.constant 0 : i32
    %c0_i32_0 = arith.constant 0 : i32
    %c0_i32_1 = arith.constant 0 : i32
    return %c0_i32, %c0_i32_0 : i32, i32
  }
  func.func @transform_3(%arg0: i32, %arg1: i32) -> (i32, i32) {
    %c0_i32 = arith.constant 0 : i32
    %c0_i32_0 = arith.constant 0 : i32
    return %arg1, %c0_i32 : i32, i32
  }
  func.func @transform_4(%arg0: i32, %arg1: i32) -> (i32, i32, i32) {
    %c0_i32 = arith.constant 0 : i32
    %c0_i32_0 = arith.constant 0 : i32
    return %arg0, %arg1, %c0_i32 : i32, i32, i32
  }
}

</mosaic_0001>

<bundles_post_ra>
// kernel: tpu_custom_call.1
= control target key start
LH: loop header
LB: loop body
LE: loop exit
PB: predicated region body
PF: predicated region fallthrough
CT: control target
= control target key end

     0   :  { %9 = vsyncpa [#allocation3], 0  ;;  %s1068_s0 = inlined_call_operand.hbm [shape: f32[2,16,16], index: 0, kind: input, shape index: {}]   ;;  %s1069_s1 = inlined_call_operand.hbm [shape: bf16[16,32], index: 1, kind: input, shape index: {}]   ;;  %s1070_s2 = inlined_call_operand.vmem [shape: f32[1,32], index: 2, kind: input, shape index: {}]   ;;  %s1071_s3 = inlined_call_operand.hbm [shape: f32[16,32], index: 3, kind: input, shape index: {}]   ;;  %s1072_s4 = inlined_call_operand.hbm [shape: f32[2,16,32], index: 4, kind: output, shape index: {}]  }
   0x1   :  { %11 = vsyncpa [#allocation3 + $0x1], 0 }
   0x2   :  { %12 = vsyncpa [#allocation6], 0 }
   0x3   :  { %13 = vsyncpa [#allocation4], 0 }
   0x4   :  { %15 = vsyncpa [#allocation4 + $0x1], 0  ;;  %s804_s15 = smov 0   ;;  %s806_s16 = smov 0  }
   0x5   :  { %s808_s17 = smov 0   ;;  %s810_s18 = smov 0  }
   0x6   :  { %s812_s19 = smov 0   ;;  %s814_s20 = smov 0  }
   0x7 LB: > { %s469_s21 = sadd.s32 4294967295, %s765_s20   ;;  %s470_s22 = sadd.s32 4294967294, %s765_s20   ;;  %s765_s20 = sphi %s814_s20, %s21_s20   ;;  %s761_s19 = sphi %s812_s19, %s1094_s19   ;;  %s757_s18 = sphi %s810_s18, %s1093_s18   ;;  %s753_s17 = sphi %s808_s17, %s1092_s17   ;;  %s749_s16 = sphi %s806_s16, %s1091_s16   ;;  %s745_s15 = sphi %s804_s15, %s1090_s15  }
   0x8   : > { %p55_p0 = scmp.ne.s32.totalorder %s749_s16, %s745_s15  ;;  %p838_p1 = scmp.eq.s32.totalorder %s469_s21, 0 }
   0x9   : > { %p842_p2 = scmp.eq.s32.totalorder %s469_s21, 1  ;;  %p155_p3 = scmp.eq.s32.totalorder %s470_s22, 1 }
   0xa   : > { %s1077_s23 = scalar_select %p838_p1, 1, 0 }
   0xb   : > { %p848_p4 = por %p838_p1, %p55_p0  ;;  %p471_p5 = scmp.ge.s32.totalorder %s765_s20, 1 }
   0xc   : > { %p853_p6 = por %p155_p3, %p55_p0  ;;  %p162_p7 = scmp.lt.s32.totalorder %s765_s20, 3 }
   0xd   : > { %s1079_s25 = scalar_select %p848_p4, 1, 0 }
   0xe   : > { %s1080_s26 = scalar_select %p853_p6, 1, 0 }
   0xf   : > { %p858_p8 = pnand %p471_p5, %p162_p7  ;;  %s767_s28 = smov [#allocation5]  }
  0x10   : > { %s174_s29 = sshll.u32 %s767_s28, 4  ;;  %s768_s5 = smov [#allocation7]   ;;  %s862_s29 = int_to_ptr.vmem [resolvable:$true] %s174_s29 }
  0x11   : > { %p513_p9 = pneg %p858_p8  ;;  %s193_s6 = sshll.u32 %s768_s5, 4  ;;  %s873_s6 = int_to_ptr.vmem [resolvable:$true] %s193_s6 }
  0x12   : > { %s593_s9 = scalar_lea.hbm %s1069_s1, 128 }
  0x13   : > { %p869_p11 = pnand %p513_p9, %p838_p1  ;;  %p594_p12 = scmp.ne.s32.totalorder %s1069_s1, %s593_s9 }
  0x14   : > { %p600_p5 = scmp.lt.u32.totalorder %s593_s9, %s1069_s1 }
  0x15   : > { %p595_p13 = pneg %p869_p11 }
  0x17   : > { %p596_p0 = pnand %p595_p13, %p594_p12 }
  0x19   : > { %p597_p3 = pneg %p596_p0 }
  0x1b   : > { %p602_p7 = pnand %p600_p5, %p597_p3 }
  0x1d   : > { %605 = shalt.err (!%p602_p7)
}
  0x1e   : > { %s606_s14 = scalar_lea.vmem %s862_s29, 128  ;;  %p614_p1 = scmp.lt.s32.totalorder %s862_s29, %s862_s29 }
  0x1f   : > { %p607_p9 = scmp.ne.s32.totalorder %s862_s29, %s606_s14  ;;  %p615_p12 = scmp.lt.s32.totalorder %s606_s14, %s606_s14 }
  0x21   : > { %p609_p10 = pnand %p607_p9, %p595_p13  ;;  %p616_p0 = por %p615_p12, %p614_p1 }
  0x23   : > { %p610_p6 = pneg %p609_p10 }
  0x25   : > { %p617_p4 = pnand %p616_p0, %p610_p6 }
  0x27   : > { %620 = shalt.err (!%p617_p4)
}
  0x28   : > { %s769_s21 = smov 64   ;;  %s770_s22 = smov 4  }
  0x29   : > { %516 = dma.hbm_to_vmem [thread:$0]  (!%p869_p11), %s1069_s1, 128, %s862_s29, [#allocation6], %s769_s21, %s769_s21, %s770_s22  }
  0x2a   : > { %s621_s9 = scalar_lea.hbm %s1071_s3, 256 }
  0x2b   : > { %p622_p1 = scmp.ne.s32.totalorder %s1071_s3, %s621_s9  ;;  %p628_p10 = scmp.lt.u32.totalorder %s621_s9, %s1071_s3 }
  0x2d   : > { %p624_p4 = pnand %p622_p1, %p595_p13 }
  0x2f   : > { %p625_p6 = pneg %p624_p4 }
  0x31   : > { %p630_p3 = pnand %p628_p10, %p625_p6 }
  0x33   : > { %633 = shalt.err (!%p630_p3)
}
  0x34   : > { %s634_s29 = scalar_lea.vmem %s873_s6, 256  ;;  %p642_p12 = scmp.lt.s32.totalorder %s873_s6, %s873_s6 }
  0x35   : > { %p635_p5 = scmp.ne.s32.totalorder %s873_s6, %s634_s29  ;;  %p643_p0 = scmp.lt.s32.totalorder %s634_s29, %s634_s29 }
  0x37   : > { %p637_p7 = pnand %p635_p5, %p595_p13  ;;  %p644_p1 = por %p643_p0, %p642_p12 }
  0x39   : > { %p638_p9 = pneg %p637_p7 }
  0x3b   : > { %p645_p4 = pnand %p644_p1, %p638_p9 }
  0x3d   : > { %648 = shalt.err (!%p645_p4)
}
  0x3e   : > { %s771_s14 = smov 128   ;;  %s772_s21 = smov 8  }
  0x3f   : > { %519 = dma.hbm_to_vmem [thread:$0]  (!%p869_p11), %s1071_s3, 256, %s873_s6, [#allocation6], %s771_s14, %s771_s14, %s772_s21  }
  0x40   : > { %s33_s5 = sadd.s32 1, %s761_s19  ;;  %s42_s7 = sadd.s32 1, %s753_s17 }
  0x41   : > { %p35_p13 = scmp.ge.s32.totalorder %s33_s5, 2  ;;  %p49_p6 = scmp.ne.s32.totalorder %s753_s17, %s749_s16 }
  0x42   : > { %p50_p10 = scmp.eq.s32.totalorder %s765_s20, 0  ;;  %p530_p3 = scmp.lt.s32.totalorder %s765_s20, 2 }
  0x43   : > { %s1096_s5 = smov (%p35_p13, %s33_s5), 0  ;;  %p940_p7 = por %p842_p2, %p49_p6 }
  0x44   : > { %p51_p5 = por %p50_p10, %p49_p6  ;;  %s37_s8 = ssub.s32 %s761_s19, %s1096_s5 }
  0x45   : > { %s1083_s30 = scalar_select %p940_p7, 1, 0 }
  0x46   : > { %s207_s9 = sand.u32 1, %s753_s17   ;;  %p40_p9 = scmp.eq.s32.totalorder %s37_s8, 0 }
  0x47   : > { %s475_s6 = sshll.u32 %s207_s9, 4  ;;  %s491_s10 = sshll.u32 %s761_s19, 8 }
  0x48   : > { %s949_s11 = scalar_select %p40_p9, %s753_s17, %s42_s7  }
  0x49   : > { %s954_s29 = scalar_lea.hbm %s1068_s0, %s491_s10  ;;  %s211_s24 = scalar_lea.vmem [#allocation2], %s475_s6 }
  0x4a   : > { %s220_s22 = sshll.u32 %s211_s24, 4  ;;  %p958_p2 = pnand %p530_p3, %p51_p5  ;;  %s962_s22 = int_to_ptr.vmem [resolvable:$true] %s220_s22 }
  0x4b   : > { %s964_s7 = scalar_lea.sflag [#allocation3], %s207_s9  ;;  %s649_s8 = scalar_lea.hbm %s954_s29, 256 }
  0x4c   : > { %p650_p11 = scmp.ne.s32.totalorder %s954_s29, %s649_s8  ;;  %p651_p12 = pneg %p958_p2 }
  0x4d   : > { %s654_s12 = scalar_lea.hbm %s1068_s0, 512  ;;  %p655_p4 = scmp.lt.u32.totalorder %s954_s29, %s1068_s0 }
  0x4e   : > { %p652_p0 = pnand %p651_p12, %p650_p11  ;;  %p656_p13 = scmp.lt.u32.totalorder %s654_s12, %s649_s8 }
  0x4f   : > { %p658_p10 = scmp.lt.u32.totalorder %s649_s8, %s954_s29 }
  0x50   : > { %p653_p1 = pneg %p652_p0  ;;  %p657_p6 = por %p656_p13, %p655_p4 }
  0x52   : > { %p659_p3 = por %p658_p10, %p657_p6 }
  0x54   : > { %p660_p5 = pnand %p659_p3, %p653_p1 }
  0x56   : > { %663 = shalt.err (!%p660_p5)
}
  0x57   : > { %s664_s9 = scalar_lea.vmem %s962_s22, 256  ;;  %s773_s6 = smov [#allocation2]  }
  0x58   : > { %p665_p9 = scmp.ne.s32.totalorder %s962_s22, %s664_s9  ;;  %s669_s10 = sshll.u32 %s773_s6, 4  ;;  %s670_s10 = int_to_ptr.vmem [resolvable:$false] %s669_s10 }
  0x59   : > { %s671_s13 = scalar_lea.vmem %s670_s10, 512  ;;  %p672_p7 = scmp.lt.s32.totalorder %s962_s22, %s670_s10 }
  0x5a   : > { %p667_p11 = pnand %p665_p9, %p651_p12  ;;  %p673_p4 = scmp.lt.s32.totalorder %s671_s13, %s664_s9 }
  0x5c   : > { %p668_p0 = pneg %p667_p11  ;;  %p674_p13 = por %p673_p4, %p672_p7 }
  0x5e   : > { %p675_p6 = pnand %p674_p13, %p668_p0 }
  0x60   : > { %678 = shalt.err (!%p675_p6)
}
  0x61   : > { %523 = dma.hbm_to_vmem [thread:$0]  (!%p958_p2), %s954_s29, 256, %s962_s22, %s964_s7, %s771_s14, %s771_s14, %s772_s21  }
  0x62   : > { %232 = sbr.rel (%p858_p8) target bundleno = 347 (0x15b), region = 36  ;;  %s998_s8 = sand.u32 (!%p858_p8), 1, %s749_s16  }
  0x63   : > { %s479_s12 = sshll.u32 (!%p858_p8), %s998_s8, 4  ;;  %s235_s24 = scalar_lea.sflag (!%p858_p8), [#allocation3], %s998_s8 }
  0x64   : > { %s238_s9 = scalar_lea.vmem (!%p858_p8), [#allocation2], %s479_s12  ;;  %p1085_p7 = scmp.ne.s32.totalorder (!%p858_p8), %s1079_s25, 0 }
  0x69   : > { %732 = dma.done.wait (%p1085_p7), %s235_s24, 256  }
  0x6a   : > { %734 = vsyncadd (%p1085_p7), %s235_s24, 4294967040  ;;  %p1086_p12 = scmp.ne.s32.totalorder %s1077_s23, 0 }
  0x6c   : > { %736 = dma.done.wait (%p1086_p12), [#allocation6], 384  }
  0x6d   : > { %738 = vsyncadd (%p1086_p12), [#allocation6], 4294966912  ;;  %v774_v0 = vmov 0.0   ;;  %vm775_vm0 = vmmov 0   ;;  %v592_v1 = vld [vmem:[#allocation5] sm:$0xff]   ;;  %v276_v3 = vld [vmem:[%s238_s9 + $0x8] sm:$0xff] }
  0x6e   : > { %495 = vmatprep.subr.bf16.mxu0 %v774_v0  ;;  %497 = vmatprep.mubr.msk.bf16.mxu0 %vm775_vm0, %v774_v0  ;;  %v275_v2 = vld [vmem:[%s238_s9] sm:$0xff]  ;;  %vm293_vm1 = vcmask 130048   ;;  %v338_v7 = vld [vmem:[#allocation7] sm:$0xff]  ;;  %s492_s23 = sshll.u32 %s757_s18, 8  ;;  %s270_s14 = scalar_lea.vmem [#allocation8], %s479_s12  ;;  %vm342_vm2 = vcmask 261120  }
  0x6f   : > { %496 = vmatpush3.bf16.msra.mxu0 %v592_v1  ;;  %v277_v4 = vpack.c.bf16 %v276_v3, %v275_v2  ;;  %v483_v5 = vld [vmem:[%s1070_s2] ss:$0 sm:$0xff]  ;;  %s361_s21 = sshll.u32 %s270_s14, 4  ;;  %v339_v11 = vld [vmem:[#allocation7 + $0x8] sm:$0xff]  ;;  %s1017_s28 = scalar_lea.hbm %s1072_s4, %s492_s23  ;;  %s1019_s21 = int_to_ptr.vmem [resolvable:$true] %s361_s21 }
  0x70   : > { %s346_s18 = scalar_lea.sflag [#allocation4], %s998_s8  ;;  %s679_s7 = scalar_lea.vmem %s1019_s21, 256 }
  0x71   : > { %p680_p8 = scmp.ne.s32.totalorder %s1019_s21, %s679_s7  ;;  %p1087_p2 = scmp.ne.s32.totalorder %s1083_s30, 0 }
  0x72   : > { %498 = vmatmul.mubr.msk.bf16.vlgmr.msra.gmra.mrb[0].mxu0 %vm293_vm1, %v277_v4  ;;  %s776_s6 = smov [#allocation8]  }
  0x73   : > { %p681_p1 = pnand %p680_p8, %p1087_p2  ;;  %s683_s10 = sshll.u32 %s776_s6, 4  ;;  %s684_s10 = int_to_ptr.vmem [resolvable:$false] %s683_s10 }
  0x74   : > { %s685_s13 = scalar_lea.vmem %s684_s10, 512  ;;  %p686_p3 = scmp.lt.s32.totalorder %s1019_s21, %s684_s10 }
  0x75   : > { %p682_p10 = pneg %p681_p1  ;;  %p687_p5 = scmp.lt.s32.totalorder %s685_s13, %s679_s7 }
  0x77   : > { %p688_p9 = por %p687_p5, %p686_p3 }
  0x79   : > { %p689_p11 = pnand %p688_p9, %p682_p10 }
 0x145   : > { %v331_v6 = vpop.f32.mrb[0].mxu0 }
 0x146   : > { %v332_v8 = vadd.f32 %v483_v5, %v331_v6  ;;  %v499_v9 = vpop.f32.mrb[1].mxu0 }
 0x147   : > { %v334_v10 = vpop.f32.mrb[2].mxu0 }
 0x148   : > { %v340_v12 = vadd.f32 %v338_v7, %v332_v8  ;;  %v335_v13 = vadd.f32 %v483_v5, %v334_v10  ;;  %v500_v14 = vpop.f32.mrb[3].mxu0 }
 0x14a   : > { %343 = vst.msk [vmem:[%s270_s14] sm:$0xff] %vm342_vm2, %v340_v12  ;;  %v341_v15 = vadd.f32 %v339_v11, %v335_v13 }
 0x14c   : > { %344 = vst.msk [vmem:[%s270_s14 + $0x8] sm:$0xff] %vm342_vm2, %v341_v15 }
 0x14d   : > { %692 = shalt.err (!%p689_p11)
}
 0x14e   : > { %s693_s12 = scalar_lea.hbm %s1017_s28, 256  ;;  %s697_s25 = scalar_lea.hbm %s1072_s4, 512 }
 0x14f   : > { %p694_p0 = scmp.ne.s32.totalorder %s1017_s28, %s693_s12  ;;  %p698_p6 = scmp.lt.u32.totalorder %s1017_s28, %s1072_s4 }
 0x150   : > { %p699_p7 = scmp.lt.u32.totalorder %s697_s25, %s693_s12  ;;  %p701_p8 = scmp.lt.u32.totalorder %s693_s12, %s1017_s28 }
 0x151   : > { %p695_p4 = pnand %p694_p0, %p1087_p2 }
 0x152   : > { %p700_p12 = por %p699_p7, %p698_p6 }
 0x153   : > { %p696_p13 = pneg %p695_p4 }
 0x154   : > { %p702_p1 = por %p701_p8, %p700_p12 }
 0x156   : > { %p703_p10 = pnand %p702_p1, %p696_p13 }
 0x158   : > { %706 = shalt.err (!%p703_p10)
}
 0x159   : > { %s777_s14 = smov 128   ;;  %s778_s29 = smov 8  }
 0x15a   : > { %511 = dma.vmem_to_hbm [thread:$0]  (%p1087_p2), %s1019_s21, 256, %s1017_s28, %s346_s18, %s777_s14, %s777_s14, %s778_s29  }
 0x15b PF: > { %s376_s22 = sand.u32 1, %s745_s15   ;;  %p1088_p3 = scmp.ne.s32.totalorder %s1080_s26, 0 }
 0x15c   : > { %p1089_p5 = scmp.ge.s32.totalorder %s765_s20, 2  ;;  %s377_s7 = scalar_lea.sflag [#allocation4], %s376_s22 }
 0x15e   : > { %p525_p9 = pnand %p1089_p5, %p1088_p3 }
 0x160   : > { %740 = dma.done.wait (!%p525_p9), %s377_s7, 256  }
 0x161   : > { %742 = vsyncadd (!%p525_p9), %s377_s7, 4294967040  ;;  %s21_s20 = sadd.s32 1, %s765_s20   ;;  %s1090_s15 = smov %s749_s16 }
 0x162   : > { %p18_p11 = scmp.ge.s32.totalorder %s21_s20, 4   ;;  %s1091_s16 = smov %s753_s17 }
 0x163   : > { %s1092_s17 = smov %s949_s11  ;;  %s1093_s18 = smov %s761_s19 }
 0x164   : > { %s1094_s19 = smov %s1096_s5  ;;  %20 = sbr.rel (!%p18_p11) target bundleno = 7 (0x7), region = 90 }
 0x16b   :  { %382 = vsyncpa [#allocation3], 1 }
 0x16c   :  { %384 = vsyncpa [#allocation3 + $0x1], 1 }
 0x16d   :  { %385 = vsyncpa [#allocation6], 1 }
 0x16e   :  { %386 = vsyncpa [#allocation4], 1 }
 0x16f   :  { %388 = vsyncpa [#allocation4 + $0x1], 1 }

</bundles_post_ra>
